<compile_context>
chip_gen: v5e
topology: v5e:2x2
jax: 0.10.0
libtpu: 0.0.40
codegen_flags: <defaults>
</compile_context>

<pallas_src>
import functools

import jax
import jax.numpy as jnp
from jax.experimental import pallas as pl
from jax.experimental.pallas import tpu as pltpu


def _round_up(x, m):
    return ((x + m - 1) // m) * m


def _vmem_capacity_bytes():
    """Physical VMEM per TensorCore; v7x-safe (smallest) fallback if the query fails."""
    try:
        return int(pltpu.get_tpu_info().vmem_capacity_bytes)
    except Exception:
        return 64 << 20


def _pow_gamma(x, gamma):
    """x ** gamma. Integer gamma -> multiply chain (keeps the EUP free for exp/log);
    fractional gamma -> clamp the base at 0 to avoid NaN when pt rounds above 1."""
    g = float(gamma)
    if g.is_integer() and 0.0 <= g <= 8.0:
        gi = int(g)
        if gi == 0:
            return jnp.ones_like(x)
        out = x
        for _ in range(gi - 1):
            out = out * x
        return out
    return jnp.maximum(x, 0.0) ** g


def _scalar_to_out_block(s):
    """Place a scalar tile-sum into element (0,0,0) of a (1,8,128) output block."""
    sub = jax.lax.broadcasted_iota(jnp.int32, (1, 8, 128), 1)
    lane = jax.lax.broadcasted_iota(jnp.int32, (1, 8, 128), 2)
    return jnp.where((sub == 0) & (lane == 0), s, 0.0).astype(jnp.float32)


def _lane_partials_to_out_block(acc):
    """Place (1,128) per-lane partial sums into sublane 0 of a (1,8,128) output block."""
    sub = jax.lax.broadcasted_iota(jnp.int32, (1, 8, 128), 1)
    return jnp.where(sub == 0, acc.reshape(1, 1, 128), 0.0).astype(jnp.float32)


def _floss_kernel_cls_major(logits_ref, tgt_ref, w_ref, out_ref, *, alpha, gamma,
                            n_valid, tile_n, transpose_in_kernel):
    """Small-C path: compute in sample-major (C, T) layout (samples on the 128 lanes).

    transpose_in_kernel=True : logits_ref is a contiguous (tile_n, C) block; the
                               (T,C)->(C,T) relayout is done in-register here.
    transpose_in_kernel=False: logits_ref is already (C, tile_n) (wrapper-transpose
                               fallback).
    tgt_ref: (1, tile_n) int32;  w_ref: (C, 1) f32;  out_ref: (1, 8, 128) f32.
    """
    i = pl.program_id(0)
    x = logits_ref[...].astype(jnp.float32)
    if transpose_in_kernel:
        x = x.T                                              # (T, C) -> (C, T)
    tgt = tgt_ref[...]                                        # (1, T)
    w = w_ref[...]                                            # (C, 1)
    c, t = x.shape

    # Stable log-softmax statistics over the class (sublane) axis; logp never materialized.
    m = jnp.max(x, axis=0, keepdims=True)                     # (1, T)
    z = x - m                                                  # (C, T)
    lse = jnp.log(jnp.sum(jnp.exp(z), axis=0, keepdims=True))  # (1, T)

    # Single fused target-select reduce: ce_i = w[t_i] * (lse_i - z[t_i, i]).
    cls = jax.lax.broadcasted_iota(jnp.int32, (c, 1), 0)       # (C, 1), broadcast compare
    hit = cls == tgt                                            # (C, T)
    ce = jnp.sum(jnp.where(hit, w * (lse - z), 0.0), axis=0, keepdims=True)  # (1, T)

    pt = jnp.exp(-ce)
    fl = alpha * _pow_gamma(1.0 - pt, gamma) * ce               # (1, T)

    # Ragged tail: logits are NOT padded in HBM, so out-of-range lanes of the last block
    # hold garbage — mask strictly by the global row index.
    row = i * tile_n + jax.lax.broadcasted_iota(jnp.int32, (1, t), 1)
    fl = jnp.where(row < n_valid, fl, 0.0)

    if t >= 128 and t % 128 == 0:
        # Lane-dense per-lane partials: pure VPU adds of 128-aligned lane slices; the
        # cross-lane reduction happens once in JAX over all tiles.
        acc = fl[:, 0:128]
        for k in range(1, t // 128):
            acc = acc + fl[:, k * 128:(k + 1) * 128]
        out_ref[...] = _lane_partials_to_out_block(acc)
    else:
        out_ref[...] = _scalar_to_out_block(jnp.sum(fl))


def _floss_kernel_cls_minor(logits_ref, tgt_ref, w_ref, out_ref, *, alpha, gamma,
                            n_valid, tile_n):
    """Large-C path: (tile_n, C) layout, classes on the 128-lane axis.

    logits_ref: (tile_n, C) native dtype;  tgt_ref: (tile_n, 1) int32;
    w_ref: (1, C) f32;  out_ref: (1, 8, 128) f32.
    """
    i = pl.program_id(0)
    x = logits_ref[...].astype(jnp.float32)                    # (T, C)
    tgt = tgt_ref[...]                                          # (T, 1)
    w = w_ref[...]                                              # (1, C)
    t, c = x.shape

    m = jnp.max(x, axis=1, keepdims=True)                       # (T, 1)
    z = x - m                                                    # (T, C)
    lse = jnp.log(jnp.sum(jnp.exp(z), axis=1, keepdims=True))    # (T, 1)

    cls = jax.lax.broadcasted_iota(jnp.int32, (1, c), 1)         # (1, C), broadcast compare
    hit = cls == tgt                                              # (T, C)
    ce = jnp.sum(jnp.where(hit, w * (lse - z), 0.0), axis=1, keepdims=True)  # (T, 1)

    pt = jnp.exp(-ce)
    fl = alpha * _pow_gamma(1.0 - pt, gamma) * ce                 # (T, 1)

    row = i * tile_n + jax.lax.broadcasted_iota(jnp.int32, (t, 1), 0)
    fl = jnp.where(row < n_valid, fl, 0.0)

    # (T, 1) is lane-sparse by construction here; the per-tile sum is negligible next to
    # the (T, C) work when C is large.
    out_ref[...] = _scalar_to_out_block(jnp.sum(fl))


def _pick_tile_n(n, c, itemsize, class_major, requested=None):
    """Pick a tile over N that fits the double-buffered input blocks (including VMEM
    lane/sublane padding of C) plus ~6 tile-sized f32 temporaries in ~1/3 of physical
    VMEM, so the explicit vmem_limit (2/3 of physical) has 2x headroom."""
    cap = _vmem_capacity_bytes()
    budget = min(cap // 3, 48 << 20)
    if class_major:
        step, cap_n = 128, 65536
        # input block is (tile_n, C): C pads to 128 lanes in VMEM; class-major temps pad
        # C to 8 sublanes; one lane-padded f32 upcast of the input tile.
        per_sample = 2 * (128 * itemsize + 4) + (128 * 4 + 6 * 8 * 4)
    else:
        step, cap_n = 8, 4096
        c_pad = _round_up(c, 128)
        per_sample = 2 * (c_pad * itemsize + 4) + 6 * c_pad * 4
    if n < step:
        return n, cap                      # single full-extent block, no padding needed
    tile = requested if requested is not None else budget // per_sample
    tile = max(step, min(int(tile), cap_n, (n // step) * step))
    tile = (tile // step) * step
    return tile, cap


def focal_loss(logits, target, mask=None, *, weight=None, alpha=1.0, gamma=2.0,
               tile_n=None):
    """Pallas TPU focal loss.  `mask` is accepted but unused (see module TODO)."""
    del mask  # TODO(synk): mask has no well-defined CrossEntropyLoss semantics.
    n, c = logits.shape
    if weight is None:
        weight = jnp.ones((c,), jnp.float32)
    weight = jnp.asarray(weight, jnp.float32).reshape(c)
    target = jnp.asarray(target, jnp.int32).reshape(n)

    class_major = c <= 32            # small class count -> samples on the 128-lane axis
    itemsize = jnp.dtype(logits.dtype).itemsize
    tile_n, vmem_cap = _pick_tile_n(n, c, itemsize, class_major, requested=tile_n)

    num_tiles = pl.cdiv(n, tile_n)
    vmem_limit = int(min(max(vmem_cap * 2 // 3, 32 << 20), 112 << 20))
    cparams = pltpu.CompilerParams(
        dimension_semantics=("parallel",),        # TODO(synk): CORE_PARALLEL on v7x
        vmem_limit_bytes=vmem_limit,
    )
    out_shape = jax.ShapeDtypeStruct((num_tiles, 8, 128), jnp.float32)
    out_spec = pl.BlockSpec((1, 8, 128), lambda i: (i, 0, 0))

    if class_major:
        tgt2 = target.reshape(1, n)
        w2 = weight.reshape(c, 1)

        def call(arr, transpose_in_kernel):
            kern = functools.partial(
                _floss_kernel_cls_major, alpha=float(alpha), gamma=float(gamma),
                n_valid=n, tile_n=tile_n, transpose_in_kernel=transpose_in_kernel)
            if transpose_in_kernel:
                log_spec = pl.BlockSpec((tile_n, c), lambda i: (i, 0))   # contiguous DMA
            else:
                log_spec = pl.BlockSpec((c, tile_n), lambda i: (0, i))   # pre-transposed
            return pl.pallas_call(
                kern,
                out_shape=out_shape,
                grid=(num_tiles,),
                in_specs=[log_spec,
                          pl.BlockSpec((1, tile_n), lambda i: (0, i)),   # targets (lanes)
                          pl.BlockSpec((c, 1), lambda i: (0, 0))],       # weights, resident
                out_specs=out_spec,
                compiler_params=cparams,
            )(arr, tgt2, w2)

        try:
            partials = jax.block_until_ready(call(logits, True))
        except Exception:
            # TODO(synk): this Mosaic toolchain rejected the in-register (T,C)->(C,T)
            # relayout; fall back to a wrapper-side transpose (one extra HBM pass over the
            # logits) rather than fail.
            partials = call(logits.T, False)
    else:
        kern = functools.partial(_floss_kernel_cls_minor, alpha=float(alpha),
                                 gamma=float(gamma), n_valid=n, tile_n=tile_n)
        partials = pl.pallas_call(
            kern,
            out_shape=out_shape,
            grid=(num_tiles,),
            in_specs=[pl.BlockSpec((tile_n, c), lambda i: (i, 0)),       # logits, streamed
                      pl.BlockSpec((tile_n, 1), lambda i: (i, 0)),       # targets column
                      pl.BlockSpec((1, c), lambda i: (0, 0))],           # weights, resident
            out_specs=out_spec,
            compiler_params=cparams,
        )(logits, target.reshape(n, 1), weight.reshape(1, c))

    # Cross-tile reduction + plain mean over the ORIGINAL N (the module's torch.mean).
    return jnp.sum(partials) / jnp.float32(n)


def _ref_focal_loss(logits, target, weight, alpha, gamma):
    """Pure-JAX reference (straight port of the PyTorch module)."""
    logits = logits.astype(jnp.float32)
    logp = jax.nn.log_softmax(logits, axis=-1)
    nll = -jnp.take_along_axis(logp, target[:, None].astype(jnp.int32), axis=1)[:, 0]
    ce = weight[target] * nll
    pt = jnp.exp(-ce)
    return jnp.mean(alpha * (1.0 - pt) ** gamma * ce)


if __name__ == "__main__":
    key = jax.random.PRNGKey(0)
    k1, k2, k3, k4, k5, k6 = jax.random.split(key, 6)

    # Case 1: module defaults (weight=[1,1,1], alpha=1, gamma=2), C=3, f32, N < 128.
    N1, C1 = 16, 3
    logits1 = jax.random.normal(k1, (N1, C1), dtype=jnp.float32)
    target1 = jax.random.randint(k2, (N1,), 0, C1, dtype=jnp.int32)
    mask1 = jnp.ones((N1,), jnp.float32)          # accepted but unused
    w1 = jnp.array([1.0, 1.0, 1.0], jnp.float32)
    out1 = focal_loss(logits1, target1, mask1, weight=w1, alpha=1.0, gamma=2.0)
    jax.block_until_ready(out1)
    ref1 = _ref_focal_loss(logits1, target1, w1, 1.0, 2.0)
    assert jnp.allclose(out1, ref1, atol=1e-5, rtol=1e-5), (out1, ref1)

    # Case 2: large class count -> class-minor path, native bf16 ingest, fractional gamma.
    N2, C2 = 64, 256
    logits2 = jax.random.normal(k3, (N2, C2), dtype=jnp.float32).astype(jnp.bfloat16)
    target2 = jax.random.randint(k4, (N2,), 0, C2, dtype=jnp.int32)
    w2 = jnp.ones((C2,), jnp.float32)
    out2 = focal_loss(logits2, target2, None, weight=w2, alpha=1.0, gamma=1.5)
    jax.block_until_ready(out2)
    ref2 = _ref_focal_loss(logits2, target2, w2, 1.0, 1.5)
    assert jnp.allclose(out2, ref2, atol=1e-3, rtol=1e-3), (out2, ref2)

    # Case 3: multi-tile grid with a ragged tail (no padding, in-kernel row mask),
    #         non-uniform class weights, small-C sample-major path, tile_n forced to 128.
    N3, C3 = 200, 3
    logits3 = jax.random.normal(k5, (N3, C3), dtype=jnp.float32)
    target3 = jax.random.randint(k6, (N3,), 0, C3, dtype=jnp.int32)
    w3 = jnp.array([0.2, 1.0, 2.5], jnp.float32)
    out3 = focal_loss(logits3, target3, None, weight=w3, alpha=0.5, gamma=3.0,
                      tile_n=128)
    jax.block_until_ready(out3)
    ref3 = _ref_focal_loss(logits3, target3, w3, 0.5, 3.0)
    assert jnp.allclose(out3, ref3, atol=1e-4, rtol=1e-4), (out3, ref3)

    print("KERNEL_OK")
</pallas_src>

<mosaic_0001>
module attributes {stable_mosaic.version = 11 : i64} {
  func.func @_floss_kernel_cls_major(%arg0: i32, %arg1: memref<16x3xf32, #tpu.memory_space<vmem>>, %arg2: memref<1x16xi32, #tpu.memory_space<vmem>>, %arg3: memref<3x1xf32, #tpu.memory_space<vmem>>, %arg4: memref<1x8x128xf32, #tpu.memory_space<vmem>>) attributes {dimension_semantics = [#tpu.dimension_semantics<parallel>], iteration_bounds = array<i64: 1>, scalar_prefetch = 0 : i64, scratch_operands = 0 : i64, tpu.core_type = #tpu.core_type<tc>, window_params = [{transform_indices = @transform_0, window_bounds = array<i64: 16, 3>}, {transform_indices = @transform_1, window_bounds = array<i64: 1, 16>}, {pipeline_mode = #tpu.pipeline_mode<synchronous>, transform_indices = @transform_2, window_bounds = array<i64: 3, 1>}, {transform_indices = @transform_3, window_bounds = array<i64: 1, 8, 128>}]} {
    %c0 = arith.constant 0 : index
    %c0_0 = arith.constant 0 : index
    %0 = vector.load %arg1[%c0, %c0_0] : memref<16x3xf32, #tpu.memory_space<vmem>>, vector<16x3xf32>
    %1 = tpu.transpose %0, [1, 0] : vector<16x3xf32> -> vector<3x16xf32>
    %c0_1 = arith.constant 0 : index
    %c0_2 = arith.constant 0 : index
    %2 = vector.load %arg2[%c0_1, %c0_2] : memref<1x16xi32, #tpu.memory_space<vmem>>, vector<1x16xi32>
    %c0_3 = arith.constant 0 : index
    %c0_4 = arith.constant 0 : index
    %3 = vector.load %arg3[%c0_3, %c0_4] : memref<3x1xf32, #tpu.memory_space<vmem>>, vector<3x1xf32>
    %cst = arith.constant dense<0xFF800000> : vector<16xf32>
    %4 = vector.multi_reduction <maximumf>, %1, %cst [0] : vector<3x16xf32> to vector<16xf32>
    %5 = vector.shape_cast %4 : vector<16xf32> to vector<1x16xf32>
    %6 = vector.broadcast %5 : vector<1x16xf32> to vector<3x16xf32>
    %7 = arith.subf %1, %6 : vector<3x16xf32>
    %8 = math.exp %7 : vector<3x16xf32>
    %cst_5 = arith.constant dense<0.000000e+00> : vector<16xf32>
    %9 = vector.multi_reduction <add>, %8, %cst_5 [0] : vector<3x16xf32> to vector<16xf32>
    %10 = vector.shape_cast %9 : vector<16xf32> to vector<1x16xf32>
    %11 = math.log %10 : vector<1x16xf32>
    %12 = tpu.iota {dimensions = array<i32: 0>} : vector<3x1xi32>
    %13 = vector.broadcast %12 : vector<3x1xi32> to vector<3x16xi32>
    %14 = vector.broadcast %2 : vector<1x16xi32> to vector<3x16xi32>
    %15 = arith.cmpi eq, %13, %14 : vector<3x16xi32>
    %16 = vector.broadcast %11 : vector<1x16xf32> to vector<3x16xf32>
    %17 = arith.subf %16, %7 : vector<3x16xf32>
    %18 = vector.broadcast %3 : vector<3x1xf32> to vector<3x16xf32>
    %19 = arith.mulf %18, %17 : vector<3x16xf32>
    %cst_6 = arith.constant 0.000000e+00 : f32
    %20 = vector.broadcast %cst_6 : f32 to vector<3x16xf32>
    %21 = arith.select %15, %19, %20 : vector<3x16xi1>, vector<3x16xf32>
    %cst_7 = arith.constant dense<0.000000e+00> : vector<16xf32>
    %22 = vector.multi_reduction <add>, %21, %cst_7 [0] : vector<3x16xf32> to vector<16xf32>
    %23 = vector.shape_cast %22 : vector<16xf32> to vector<1x16xf32>
    %cst_8 = arith.constant 0.000000e+00 : f32
    %24 = vector.broadcast %cst_8 : f32 to vector<1x16xf32>
    %25 = arith.subf %24, %23 : vector<1x16xf32>
    %26 = math.exp %25 : vector<1x16xf32>
    %cst_9 = arith.constant 1.000000e+00 : f32
    %27 = vector.broadcast %cst_9 : f32 to vector<1x16xf32>
    %28 = arith.subf %27, %26 : vector<1x16xf32>
    %29 = arith.mulf %28, %28 : vector<1x16xf32>
    %cst_10 = arith.constant 1.000000e+00 : f32
    %30 = vector.broadcast %cst_10 : f32 to vector<1x16xf32>
    %31 = arith.mulf %30, %29 : vector<1x16xf32>
    %32 = arith.mulf %31, %23 : vector<1x16xf32>
    %c16_i32 = arith.constant 16 : i32
    %33 = arith.muli %arg0, %c16_i32 : i32
    %34 = tpu.iota {dimensions = array<i32: 1>} : vector<1x16xi32>
    %35 = vector.broadcast %33 : i32 to vector<1x16xi32>
    %36 = arith.addi %35, %34 : vector<1x16xi32>
    %c16_i32_11 = arith.constant 16 : i32
    %37 = vector.broadcast %c16_i32_11 : i32 to vector<1x16xi32>
    %38 = arith.cmpi slt, %36, %37 : vector<1x16xi32>
    %cst_12 = arith.constant 0.000000e+00 : f32
    %39 = vector.broadcast %cst_12 : f32 to vector<1x16xf32>
    %40 = arith.select %38, %32, %39 : vector<1x16xi1>, vector<1x16xf32>
    %41 = vector.shape_cast %40 : vector<1x16xf32> to vector<1x1x16xf32>
    %cst_13 = arith.constant dense<0.000000e+00> : vector<1xf32>
    %42 = vector.multi_reduction <add>, %41, %cst_13 [1, 2] : vector<1x1x16xf32> to vector<1xf32>
    %43 = vector.shape_cast %42 : vector<1xf32> to vector<1x1x1xf32>
    %44 = vector.extract %43[0, 0, 0] : f32 from vector<1x1x1xf32>
    %45 = tpu.iota {dimensions = array<i32: 1>} : vector<1x8x128xi32>
    %46 = tpu.iota {dimensions = array<i32: 2>} : vector<1x8x128xi32>
    %c0_i32 = arith.constant 0 : i32
    %47 = vector.broadcast %c0_i32 : i32 to vector<1x8x128xi32>
    %48 = arith.cmpi eq, %45, %47 : vector<1x8x128xi32>
    %c0_i32_14 = arith.constant 0 : i32
    %49 = vector.broadcast %c0_i32_14 : i32 to vector<1x8x128xi32>
    %50 = arith.cmpi eq, %46, %49 : vector<1x8x128xi32>
    %51 = arith.andi %48, %50 : vector<1x8x128xi1>
    %cst_15 = arith.constant 0.000000e+00 : f32
    %52 = vector.broadcast %44 : f32 to vector<1x8x128xf32>
    %53 = vector.broadcast %cst_15 : f32 to vector<1x8x128xf32>
    %54 = arith.select %51, %52, %53 : vector<1x8x128xi1>, vector<1x8x128xf32>
    %c0_16 = arith.constant 0 : index
    %c0_17 = arith.constant 0 : index
    %c0_18 = arith.constant 0 : index
    %55 = vector.load %arg4[%c0_16, %c0_17, %c0_18] : memref<1x8x128xf32, #tpu.memory_space<vmem>>, vector<1x8x128xf32>
    tpu.vector_store %arg4[%c0_16, %c0_17, %c0_18], %54 {strides = array<i32>} : memref<1x8x128xf32, #tpu.memory_space<vmem>>, vector<1x8x128xf32>,
    return
  }
  func.func @transform_0(%arg0: i32) -> (i32, i32) {
    %c0_i32 = arith.constant 0 : i32
    %c0_i32_0 = arith.constant 0 : i32
    return %arg0, %c0_i32 : i32, i32
  }
  func.func @transform_1(%arg0: i32) -> (i32, i32) {
    %c0_i32 = arith.constant 0 : i32
    %c0_i32_0 = arith.constant 0 : i32
    return %c0_i32, %arg0 : i32, i32
  }
  func.func @transform_2(%arg0: i32) -> (i32, i32) {
    %c0_i32 = arith.constant 0 : i32
    %c0_i32_0 = arith.constant 0 : i32
    %c0_i32_1 = arith.constant 0 : i32
    return %c0_i32, %c0_i32_0 : i32, i32
  }
  func.func @transform_3(%arg0: i32) -> (i32, i32, i32) {
    %c0_i32 = arith.constant 0 : i32
    %c0_i32_0 = arith.constant 0 : i32
    %c0_i32_1 = arith.constant 0 : i32
    return %arg0, %c0_i32, %c0_i32_0 : i32, i32, i32
  }
}

module attributes {stable_mosaic.version = 11 : i64} {
  func.func @_floss_kernel_cls_major(%arg0: i32, %arg1: memref<3x16xf32, #tpu.memory_space<vmem>>, %arg2: memref<1x16xi32, #tpu.memory_space<vmem>>, %arg3: memref<3x1xf32, #tpu.memory_space<vmem>>, %arg4: memref<1x8x128xf32, #tpu.memory_space<vmem>>) attributes {dimension_semantics = [#tpu.dimension_semantics<parallel>], iteration_bounds = array<i64: 1>, scalar_prefetch = 0 : i64, scratch_operands = 0 : i64, tpu.core_type = #tpu.core_type<tc>, window_params = [{transform_indices = @transform_0, window_bounds = array<i64: 3, 16>}, {transform_indices = @transform_1, window_bounds = array<i64: 1, 16>}, {pipeline_mode = #tpu.pipeline_mode<synchronous>, transform_indices = @transform_2, window_bounds = array<i64: 3, 1>}, {transform_indices = @transform_3, window_bounds = array<i64: 1, 8, 128>}]} {
    %c0 = arith.constant 0 : index
    %c0_0 = arith.constant 0 : index
    %0 = vector.load %arg1[%c0, %c0_0] : memref<3x16xf32, #tpu.memory_space<vmem>>, vector<3x16xf32>
    %c0_1 = arith.constant 0 : index
    %c0_2 = arith.constant 0 : index
    %1 = vector.load %arg2[%c0_1, %c0_2] : memref<1x16xi32, #tpu.memory_space<vmem>>, vector<1x16xi32>
    %c0_3 = arith.constant 0 : index
    %c0_4 = arith.constant 0 : index
    %2 = vector.load %arg3[%c0_3, %c0_4] : memref<3x1xf32, #tpu.memory_space<vmem>>, vector<3x1xf32>
    %cst = arith.constant dense<0xFF800000> : vector<16xf32>
    %3 = vector.multi_reduction <maximumf>, %0, %cst [0] : vector<3x16xf32> to vector<16xf32>
    %4 = vector.shape_cast %3 : vector<16xf32> to vector<1x16xf32>
    %5 = vector.broadcast %4 : vector<1x16xf32> to vector<3x16xf32>
    %6 = arith.subf %0, %5 : vector<3x16xf32>
    %7 = math.exp %6 : vector<3x16xf32>
    %cst_5 = arith.constant dense<0.000000e+00> : vector<16xf32>
    %8 = vector.multi_reduction <add>, %7, %cst_5 [0] : vector<3x16xf32> to vector<16xf32>
    %9 = vector.shape_cast %8 : vector<16xf32> to vector<1x16xf32>
    %10 = math.log %9 : vector<1x16xf32>
    %11 = tpu.iota {dimensions = array<i32: 0>} : vector<3x1xi32>
    %12 = vector.broadcast %11 : vector<3x1xi32> to vector<3x16xi32>
    %13 = vector.broadcast %1 : vector<1x16xi32> to vector<3x16xi32>
    %14 = arith.cmpi eq, %12, %13 : vector<3x16xi32>
    %15 = vector.broadcast %10 : vector<1x16xf32> to vector<3x16xf32>
    %16 = arith.subf %15, %6 : vector<3x16xf32>
    %17 = vector.broadcast %2 : vector<3x1xf32> to vector<3x16xf32>
    %18 = arith.mulf %17, %16 : vector<3x16xf32>
    %cst_6 = arith.constant 0.000000e+00 : f32
    %19 = vector.broadcast %cst_6 : f32 to vector<3x16xf32>
    %20 = arith.select %14, %18, %19 : vector<3x16xi1>, vector<3x16xf32>
    %cst_7 = arith.constant dense<0.000000e+00> : vector<16xf32>
    %21 = vector.multi_reduction <add>, %20, %cst_7 [0] : vector<3x16xf32> to vector<16xf32>
    %22 = vector.shape_cast %21 : vector<16xf32> to vector<1x16xf32>
    %cst_8 = arith.constant 0.000000e+00 : f32
    %23 = vector.broadcast %cst_8 : f32 to vector<1x16xf32>
    %24 = arith.subf %23, %22 : vector<1x16xf32>
    %25 = math.exp %24 : vector<1x16xf32>
    %cst_9 = arith.constant 1.000000e+00 : f32
    %26 = vector.broadcast %cst_9 : f32 to vector<1x16xf32>
    %27 = arith.subf %26, %25 : vector<1x16xf32>
    %28 = arith.mulf %27, %27 : vector<1x16xf32>
    %cst_10 = arith.constant 1.000000e+00 : f32
    %29 = vector.broadcast %cst_10 : f32 to vector<1x16xf32>
    %30 = arith.mulf %29, %28 : vector<1x16xf32>
    %31 = arith.mulf %30, %22 : vector<1x16xf32>
    %c16_i32 = arith.constant 16 : i32
    %32 = arith.muli %arg0, %c16_i32 : i32
    %33 = tpu.iota {dimensions = array<i32: 1>} : vector<1x16xi32>
    %34 = vector.broadcast %32 : i32 to vector<1x16xi32>
    %35 = arith.addi %34, %33 : vector<1x16xi32>
    %c16_i32_11 = arith.constant 16 : i32
    %36 = vector.broadcast %c16_i32_11 : i32 to vector<1x16xi32>
    %37 = arith.cmpi slt, %35, %36 : vector<1x16xi32>
    %cst_12 = arith.constant 0.000000e+00 : f32
    %38 = vector.broadcast %cst_12 : f32 to vector<1x16xf32>
    %39 = arith.select %37, %31, %38 : vector<1x16xi1>, vector<1x16xf32>
    %40 = vector.shape_cast %39 : vector<1x16xf32> to vector<1x1x16xf32>
    %cst_13 = arith.constant dense<0.000000e+00> : vector<1xf32>
    %41 = vector.multi_reduction <add>, %40, %cst_13 [1, 2] : vector<1x1x16xf32> to vector<1xf32>
    %42 = vector.shape_cast %41 : vector<1xf32> to vector<1x1x1xf32>
    %43 = vector.extract %42[0, 0, 0] : f32 from vector<1x1x1xf32>
    %44 = tpu.iota {dimensions = array<i32: 1>} : vector<1x8x128xi32>
    %45 = tpu.iota {dimensions = array<i32: 2>} : vector<1x8x128xi32>
    %c0_i32 = arith.constant 0 : i32
    %46 = vector.broadcast %c0_i32 : i32 to vector<1x8x128xi32>
    %47 = arith.cmpi eq, %44, %46 : vector<1x8x128xi32>
    %c0_i32_14 = arith.constant 0 : i32
    %48 = vector.broadcast %c0_i32_14 : i32 to vector<1x8x128xi32>
    %49 = arith.cmpi eq, %45, %48 : vector<1x8x128xi32>
    %50 = arith.andi %47, %49 : vector<1x8x128xi1>
    %cst_15 = arith.constant 0.000000e+00 : f32
    %51 = vector.broadcast %43 : f32 to vector<1x8x128xf32>
    %52 = vector.broadcast %cst_15 : f32 to vector<1x8x128xf32>
    %53 = arith.select %50, %51, %52 : vector<1x8x128xi1>, vector<1x8x128xf32>
    %c0_16 = arith.constant 0 : index
    %c0_17 = arith.constant 0 : index
    %c0_18 = arith.constant 0 : index
    %54 = vector.load %arg4[%c0_16, %c0_17, %c0_18] : memref<1x8x128xf32, #tpu.memory_space<vmem>>, vector<1x8x128xf32>
    tpu.vector_store %arg4[%c0_16, %c0_17, %c0_18], %53 {strides = array<i32>} : memref<1x8x128xf32, #tpu.memory_space<vmem>>, vector<1x8x128xf32>,
    return
  }
  func.func @transform_0(%arg0: i32) -> (i32, i32) {
    %c0_i32 = arith.constant 0 : i32
    %c0_i32_0 = arith.constant 0 : i32
    return %c0_i32, %arg0 : i32, i32
  }
  func.func @transform_1(%arg0: i32) -> (i32, i32) {
    %c0_i32 = arith.constant 0 : i32
    %c0_i32_0 = arith.constant 0 : i32
    return %c0_i32, %arg0 : i32, i32
  }
  func.func @transform_2(%arg0: i32) -> (i32, i32) {
    %c0_i32 = arith.constant 0 : i32
    %c0_i32_0 = arith.constant 0 : i32
    %c0_i32_1 = arith.constant 0 : i32
    return %c0_i32, %c0_i32_0 : i32, i32
  }
  func.func @transform_3(%arg0: i32) -> (i32, i32, i32) {
    %c0_i32 = arith.constant 0 : i32
    %c0_i32_0 = arith.constant 0 : i32
    %c0_i32_1 = arith.constant 0 : i32
    return %arg0, %c0_i32, %c0_i32_0 : i32, i32, i32
  }
}

</mosaic_0001>

<bundles_post_ra>
// kernel: tpu_custom_call.1
= control target key start
LH: loop header
LB: loop body
LE: loop exit
PB: predicated region body
PF: predicated region fallthrough
CT: control target
= control target key end

     0   :  { %v176_v2 = vmov 0   ;;  %s216_s0 = inlined_call_operand.vmem [shape: f32[16,3], index: 0, kind: input, shape index: {}]   ;;  %s217_s1 = inlined_call_operand.vmem [shape: s32[1,16], index: 1, kind: input, shape index: {}]   ;;  %s218_s2 = inlined_call_operand.vmem [shape: f32[3,1], index: 2, kind: input, shape index: {}]   ;;  %s219_s3 = inlined_call_operand.hbm [shape: f32[1,8,128], index: 3, kind: output, shape index: {}]  }
   0x1   :  { %v15_v0 = vld [vmem:[%s216_s0] sm:$0xff]  ;;  %141 = vset.pattern.permute.xlu1 %v176_v2 }
   0x2   :  { %v50_v1 = vld [vmem:[%s218_s2] sm:$0x7]  ;;  %17 = vxpose.xlu0.b32.start [1/2] (short) (narrow) %v15_v0, 8 }
   0x3   :  { %8 = vsyncpa [#allocation3], 0  ;;  %78 = vperm.xlu1 %141, %v50_v1   ;;  %v16_v3 = vld [vmem:[%s216_s0 + $0x8] sm:$0xff]  ;;  %vm51_vm0 = vcmask 124928   ;;  %v71_v22 = vlaneseq  ;;  %v143_v25 = vld [vmem:[%s217_s1] ss:$0 sm:$0xff] }
   0x4   :  { %vm103_vm3 = vcmask 122880   ;;  %s177_s1 = smov [#allocation2]   ;;  %s127_s21 = sshll.u32 %s219_s3, 4  ;;  %s128_s21 = int_to_ptr.hbm [resolvable:$true] %s127_s21 }
   0x5   :  { %v72_v24 = vshrl.u32 %v71_v22, 7  ;;  %v98_v41 = vand.u32 127, %v71_v22  ;;  %s125_s18 = sshll.u32 %s177_s1, 4  ;;  %s126_s18 = int_to_ptr.vmem [resolvable:$true] %s125_s18 }
   0x7   :  { %vm74_vm1 = vcmp.eq.s32.totalorder %v72_v24, %v143_v25  ;;  %vm101_vm2 = vcmp.lt.s32.totalorder %v98_v41, 16  ;;  %vm114_vm4 = vcmp.eq.s32.totalorder %v72_v24, 0  ;;  %vm115_vm5 = vcmp.eq.s32.totalorder %v98_v41, 0 }
   0x8   :  { %vm116_vm6 = vmand %vm114_vm4, %vm115_vm5 }
   0xa   :  { %18 = vxpose.xlu0.b32.end [2/2] (short) (narrow) %v16_v3, 8 }
  0x71   :  { %142 = vset.pattern.permute.xlu0 %v176_v2 }
  0x75   :  { %v79_v27 = vpop.permute.xlu1 %78 }
  0xa6   :  { %v33_v4 = vpop.trf.xlu0 }
  0xa7   :  { %v52_v5 = vsel %vm51_vm0, %v33_v4, -inf }
  0xa8   :  { %v53_v6 = vrot.slane %v52_v5, 4 }
  0xaa   :  { %v54_v7 = vmax.f32 %v52_v5, %v53_v6 }
  0xac   :  { %v55_v8 = vrot.slane %v54_v7, 2 }
  0xae   :  { %v56_v9 = vmax.f32 %v54_v7, %v55_v8 }
  0xb0   :  { %v57_v10 = vrot.slane %v56_v9, 1 }
  0xb2   :  { %v58_v11 = vmax.f32 %v56_v9, %v57_v10 }
  0xb4   :  { %v59_v12 = vsub.f32 %v33_v4, %v58_v11 }
  0xb6   :  { %v60_v13 = vmul.f32 1.442695, %v59_v12 }
  0xb8   :  { %144 = vpow2.f32 %v60_v13 }
  0xbe   :  { %v145_v14 = vpop.eup %144 }
  0xbf   :  { %v62_v15 = vsel %vm51_vm0, %v145_v14, 0.0 }
  0xc0   :  { %v63_v16 = vrot.slane %v62_v15, 4 }
  0xc2   :  { %v64_v17 = vadd.f32 %v63_v16, %v62_v15 }
  0xc4   :  { %v65_v18 = vrot.slane %v64_v17, 2 }
  0xc6   :  { %v66_v19 = vadd.f32 %v65_v18, %v64_v17 }
  0xc8   :  { %v67_v20 = vrot.slane %v66_v19, 1 }
  0xca   :  { %v68_v21 = vadd.f32 %v67_v20, %v66_v19 }
  0xcc   :  { %146 = vlog2.f32 %v68_v21 }
  0xd2   :  { %v147_v23 = vpop.eup %146 }
  0xd3   :  { %v70_v26 = vmul.f32 0.6931472, %v147_v23 }
  0xd5   :  { %v75_v28 = vsub.f32 %v70_v26, %v59_v12 }
  0xd7   :  { %v81_v29 = vmul.f32 %v79_v27, %v75_v28 }
  0xd9   :  { %v82_v30 = vsel %vm74_vm1, %v81_v29, 0.0 }
  0xda   :  { %v83_v31 = vsel %vm51_vm0, %v82_v30, 0.0 }
  0xdb   :  { %v84_v32 = vrot.slane %v83_v31, 4 }
  0xdd   :  { %v85_v33 = vadd.f32 %v84_v32, %v83_v31 }
  0xdf   :  { %v86_v34 = vrot.slane %v85_v33, 2 }
  0xe1   :  { %v87_v35 = vadd.f32 %v86_v34, %v85_v33 }
  0xe3   :  { %v88_v36 = vrot.slane %v87_v35, 1 }
  0xe5   :  { %v89_v37 = vadd.f32 %v88_v36, %v87_v35 }
  0xe7   :  { %v90_v38 = vsub.f32 0.0, %v89_v37 }
  0xe9   :  { %v91_v39 = vmul.f32 1.442695, %v90_v38 }
  0xeb   :  { %148 = vpow2.f32 %v91_v39 }
  0xf1   :  { %v149_v40 = vpop.eup %148 }
  0xf2   :  { %v93_v42 = vsub.f32 1.0, %v149_v40 }
  0xf4   :  { %v94_v43 = vmul.f32 %v93_v42, %v93_v42 }
  0xf6   :  { %v95_v44 = vmul.f32 %v94_v43, %v89_v37 }
  0xf8   :  { %v102_v45 = vsel %vm101_vm2, %v95_v44, 0.0 }
  0xf9   :  { %v104_v46 = vsel %vm103_vm3, %v102_v45, 0.0 }
  0xfa   :  { %105 = vadd.xlane.f32.xlu1 %v104_v46 }
 0x16d   :  { %v106_v47 = vpop.xlane.xlu1 %105 }
 0x16e   :  { %v107_v48 = vrot.slane %v106_v47, 4 }
 0x170   :  { %v108_v49 = vadd.f32 %v107_v48, %v106_v47 }
 0x172   :  { %v109_v50 = vrot.slane %v108_v49, 2 }
 0x174   :  { %v110_v51 = vadd.f32 %v109_v50, %v108_v49 }
 0x176   :  { %v111_v52 = vrot.slane %v110_v51, 1 }
 0x178   :  { %v112_v53 = vadd.f32 %v111_v52, %v110_v51 }
 0x17a   :  { %136 = vpush %v112_v53 }
 0x1ab   :  { %s137_s22 = spop %136 }
 0x1ac   :  { %v117_v54 = vstv %s137_s22 }
 0x1ad   :  { %v118_v55 = vsel %vm116_vm6, %v117_v54, 0.0 }
 0x1ae   :  { %119 = vst [vmem:[#allocation2] sm:$0xff] %v118_v55 }
 0x1af   :  { %130 = dma.vmem_to_hbm [thread:$0]  %s126_s18, 128, %s128_s21, [#allocation3]  }
 0x1b0   :  { %174 = dma.done.wait [#allocation3], 128  }
 0x1b1   :  { %175 = vsyncadd [#allocation3], 4294967168 }
 0x1b2   :  { %135 = vsyncpa [#allocation3], 1 }

// kernel: tpu_custom_call.1
= control target key start
LH: loop header
LB: loop body
LE: loop exit
PB: predicated region body
PF: predicated region fallthrough
CT: control target
= control target key end

     0   :  { %v141_v1 = vmov 0   ;;  %s178_s0 = inlined_call_operand.vmem [shape: f32[3,16], index: 0, kind: input, shape index: {}]   ;;  %s179_s1 = inlined_call_operand.vmem [shape: s32[1,16], index: 1, kind: input, shape index: {}]   ;;  %s180_s2 = inlined_call_operand.vmem [shape: f32[3,1], index: 2, kind: input, shape index: {}]   ;;  %s181_s3 = inlined_call_operand.hbm [shape: f32[1,8,128], index: 3, kind: output, shape index: {}]  }
   0x1   :  { %v17_v0 = vld [vmem:[%s180_s2] sm:$0x7]  ;;  %107 = vset.pattern.permute.xlu0 %v141_v1 }
   0x2   :  { %8 = vsyncpa [#allocation3], 0  ;;  %45 = vperm.xlu0 %107, %v17_v0   ;;  %vm18_vm0 = vcmask 124928   ;;  %v15_v2 = vld [vmem:[%s178_s0] sm:$0x7]  ;;  %v38_v21 = vlaneseq  ;;  %vm70_vm3 = vcmask 122880  }
   0x3   :  { %v19_v3 = vsel %vm18_vm0, %v15_v2, -inf  ;;  %v108_v24 = vld [vmem:[%s179_s1] ss:$0 sm:$0xff]  ;;  %s142_s1 = smov [#allocation2]   ;;  %s94_s19 = sshll.u32 %s181_s3, 4  ;;  %s95_s19 = int_to_ptr.hbm [resolvable:$true] %s94_s19 }
   0x4   :  { %v20_v4 = vrot.slane %v19_v3, 4  ;;  %v39_v23 = vshrl.u32 %v38_v21, 7  ;;  %v65_v39 = vand.u32 127, %v38_v21  ;;  %s92_s16 = sshll.u32 %s142_s1, 4  ;;  %s93_s16 = int_to_ptr.vmem [resolvable:$true] %s92_s16 }
   0x6   :  { %v21_v5 = vmax.f32 %v19_v3, %v20_v4  ;;  %vm41_vm1 = vcmp.eq.s32.totalorder %v39_v23, %v108_v24  ;;  %vm68_vm2 = vcmp.lt.s32.totalorder %v65_v39, 16  ;;  %vm81_vm4 = vcmp.eq.s32.totalorder %v39_v23, 0 }
   0x7   :  { %vm82_vm5 = vcmp.eq.s32.totalorder %v65_v39, 0 }
   0x8   :  { %v22_v6 = vrot.slane %v21_v5, 2  ;;  %vm83_vm6 = vmand %vm81_vm4, %vm82_vm5 }
   0xa   :  { %v23_v7 = vmax.f32 %v21_v5, %v22_v6 }
   0xc   :  { %v24_v8 = vrot.slane %v23_v7, 1 }
   0xe   :  { %v25_v9 = vmax.f32 %v23_v7, %v24_v8 }
  0x10   :  { %v26_v10 = vsub.f32 %v15_v2, %v25_v9 }
  0x12   :  { %v27_v11 = vmul.f32 1.442695, %v26_v10 }
  0x14   :  { %109 = vpow2.f32 %v27_v11 }
  0x1a   :  { %v110_v12 = vpop.eup %109 }
  0x1b   :  { %v29_v13 = vsel %vm18_vm0, %v110_v12, 0.0 }
  0x1c   :  { %v30_v14 = vrot.slane %v29_v13, 4 }
  0x1e   :  { %v31_v15 = vadd.f32 %v30_v14, %v29_v13 }
  0x20   :  { %v32_v16 = vrot.slane %v31_v15, 2 }
  0x22   :  { %v33_v17 = vadd.f32 %v32_v16, %v31_v15 }
  0x24   :  { %v34_v18 = vrot.slane %v33_v17, 1 }
  0x26   :  { %v35_v19 = vadd.f32 %v34_v18, %v33_v17 }
  0x28   :  { %111 = vlog2.f32 %v35_v19 }
  0x2e   :  { %v112_v20 = vpop.eup %111 }
  0x2f   :  { %v37_v22 = vmul.f32 0.6931472, %v112_v20 }
  0x31   :  { %v42_v25 = vsub.f32 %v37_v22, %v26_v10 }
  0x74   :  { %v46_v26 = vpop.permute.xlu0 %45 }
  0x75   :  { %v48_v27 = vmul.f32 %v46_v26, %v42_v25 }
  0x77   :  { %v49_v28 = vsel %vm41_vm1, %v48_v27, 0.0 }
  0x78   :  { %v50_v29 = vsel %vm18_vm0, %v49_v28, 0.0 }
  0x79   :  { %v51_v30 = vrot.slane %v50_v29, 4 }
  0x7b   :  { %v52_v31 = vadd.f32 %v51_v30, %v50_v29 }
  0x7d   :  { %v53_v32 = vrot.slane %v52_v31, 2 }
  0x7f   :  { %v54_v33 = vadd.f32 %v53_v32, %v52_v31 }
  0x81   :  { %v55_v34 = vrot.slane %v54_v33, 1 }
  0x83   :  { %v56_v35 = vadd.f32 %v55_v34, %v54_v33 }
  0x85   :  { %v57_v36 = vsub.f32 0.0, %v56_v35 }
  0x87   :  { %v58_v37 = vmul.f32 1.442695, %v57_v36 }
  0x89   :  { %113 = vpow2.f32 %v58_v37 }
  0x8f   :  { %v114_v38 = vpop.eup %113 }
  0x90   :  { %v60_v40 = vsub.f32 1.0, %v114_v38 }
  0x92   :  { %v61_v41 = vmul.f32 %v60_v40, %v60_v40 }
  0x94   :  { %v62_v42 = vmul.f32 %v61_v41, %v56_v35 }
  0x96   :  { %v69_v43 = vsel %vm68_vm2, %v62_v42, 0.0 }
  0x97   :  { %v71_v44 = vsel %vm70_vm3, %v69_v43, 0.0 }
  0x98   :  { %72 = vadd.xlane.f32.xlu0 %v71_v44 }
 0x10b   :  { %v73_v45 = vpop.xlane.xlu0 %72 }
 0x10c   :  { %v74_v46 = vrot.slane %v73_v45, 4 }
 0x10e   :  { %v75_v47 = vadd.f32 %v74_v46, %v73_v45 }
 0x110   :  { %v76_v48 = vrot.slane %v75_v47, 2 }
 0x112   :  { %v77_v49 = vadd.f32 %v76_v48, %v75_v47 }
 0x114   :  { %v78_v50 = vrot.slane %v77_v49, 1 }
 0x116   :  { %v79_v51 = vadd.f32 %v78_v50, %v77_v49 }
 0x118   :  { %103 = vpush %v79_v51 }
 0x149   :  { %s104_s20 = spop %103 }
 0x14a   :  { %v84_v52 = vstv %s104_s20 }
 0x14b   :  { %v85_v53 = vsel %vm83_vm6, %v84_v52, 0.0 }
 0x14c   :  { %86 = vst [vmem:[#allocation2] sm:$0xff] %v85_v53 }
 0x14d   :  { %97 = dma.vmem_to_hbm [thread:$0]  %s93_s16, 128, %s95_s19, [#allocation3]  }
 0x14e   :  { %139 = dma.done.wait [#allocation3], 128  }
 0x14f   :  { %140 = vsyncadd [#allocation3], 4294967168 }
 0x150   :  { %102 = vsyncpa [#allocation3], 1 }

</bundles_post_ra>
